<compile_context>
chip_gen: v7x
topology: tpu7x:2x2x1
jax: 0.10.0
libtpu: 0.0.40
codegen_flags: <defaults>
</compile_context>

<pallas_src>
import numpy as np
import jax
import jax.numpy as jnp
from jax.experimental import pallas as pl
from jax.experimental.pallas import tpu as pltpu


# ---------------------------------------------------------------------------
# Pallas kernel: full VAE forward (encode -> reparameterize -> decode)
# ---------------------------------------------------------------------------
def vae_forward_kernel(x_ref, w1_ref, b1_ref, wlat_ref, blat_ref,
                       wdec_ref, bdec_ref, eps_ref,
                       recon_ref, lat_ref):
    lp = eps_ref.shape[-1]                       # padded latent dim (static)

    # ----- encode: h = relu(x @ w1 + b1)   (bf16 MXU operands, f32 accumulate)
    h = jnp.dot(x_ref[...], w1_ref[...],
                preferred_element_type=jnp.float32)            # [TB, Hp] f32
    h = jnp.maximum(h + b1_ref[...], 0.0)                      # ReLU in f32

    # ----- fused mu/logvar projection: [TB, 2*Lp] -----
    lat = jnp.dot(h.astype(jnp.bfloat16), wlat_ref[...],
                  preferred_element_type=jnp.float32) + blat_ref[...]
    mu = lat[:, :lp]
    logvar = lat[:, lp:]

    # ----- reparameterize (f32): z = mu + eps * exp(0.5 * logvar) -----
    z = mu + eps_ref[...].astype(jnp.float32) * jnp.exp(0.5 * logvar)

    # ----- decode: recon = z @ wdec + bdec -----
    recon = jnp.dot(z.astype(jnp.bfloat16), wdec_ref[...],
                    preferred_element_type=jnp.float32) + bdec_ref[...]

    recon_ref[...] = recon.astype(recon_ref.dtype)          # bf16 output stream
    # one contiguous lane-dense store: [ mu | logvar | z ]
    lat_ref[...] = jnp.concatenate([mu, logvar, z], axis=-1)


# ---------------------------------------------------------------------------
# Parameter init (deterministic). BaseVAE.init_weight -> xavier_normal_ for
# weights, zeros for biases. Weights are zero-padded to lane-aligned shapes
# and stored in bf16 for the MXU.
# ---------------------------------------------------------------------------
def _round_up(x, m):
    return ((x + m - 1) // m) * m


def xavier_normal(key, shape):
    fan_in, fan_out = shape
    std = np.sqrt(2.0 / (fan_in + fan_out))
    return std * jax.random.normal(key, shape, dtype=jnp.float32)


def _pad2(a, rows, cols):
    return jnp.pad(a, ((0, rows - a.shape[0]), (0, cols - a.shape[1])))


def init_params(key, in_dim, hidden_dim, latent_dim):
    d_pad = _round_up(in_dim, 128)
    h_pad = _round_up(hidden_dim, 128)
    l_pad = _round_up(latent_dim, 128)
    k1, k2, k3, k4 = jax.random.split(key, 4)
    w1 = _pad2(xavier_normal(k1, (in_dim, hidden_dim)), d_pad, h_pad)
    wmu = _pad2(xavier_normal(k2, (hidden_dim, latent_dim)), h_pad, l_pad)
    wlv = _pad2(xavier_normal(k3, (hidden_dim, latent_dim)), h_pad, l_pad)
    wdec = _pad2(xavier_normal(k4, (latent_dim, in_dim)), l_pad, d_pad)
    return {
        "w1": w1.astype(jnp.bfloat16),
        "b1": jnp.zeros((1, h_pad), jnp.float32),
        "wlat": jnp.concatenate([wmu, wlv], axis=1).astype(jnp.bfloat16),
        "blat": jnp.zeros((1, 2 * l_pad), jnp.float32),
        "wdec": wdec.astype(jnp.bfloat16),
        "bdec": jnp.zeros((1, d_pad), jnp.float32),
        "dims": (in_dim, hidden_dim, latent_dim, d_pad, h_pad, l_pad),
    }


# ---------------------------------------------------------------------------
# Wrapper
# ---------------------------------------------------------------------------
def vae_forward(x_nchw, params, eps):
    in_dim, hidden_dim, latent_dim, d_pad, h_pad, l_pad = params["dims"]
    B = x_nchw.shape[0]
    D = int(np.prod(x_nchw.shape[1:]))
    assert D == in_dim

    # Batch tile: multiple of 16 sublane-pairs (bf16 packing), up to 256 rows.
    tb = min(256, _round_up(B, 16))
    b_pad = _round_up(B, tb)
    # v7x megacore hygiene: prefer >=2 grid steps so the "parallel" batch axis
    # actually shards across both TensorCores (no-op on single-TC v5e/v6e).
    if b_pad // tb < 2 and tb >= 32:
        tb //= 2
        b_pad = _round_up(B, tb)
    nb = b_pad // tb

    # Pad only when needed (aligned case: zero extra HBM passes).
    x_flat = x_nchw.reshape(B, D)
    if (b_pad, d_pad) != (B, D):
        x_flat = jnp.pad(x_flat, ((0, b_pad - B), (0, d_pad - D)))
    x_p = x_flat.astype(jnp.bfloat16)

    eps_p = eps
    if (b_pad, l_pad) != eps.shape:
        eps_p = jnp.pad(eps, ((0, b_pad - B), (0, l_pad - latent_dim)))
    eps_p = eps_p.astype(jnp.bfloat16)

    # ----- VMEM budget (Buffered(1) weights, double-buffered batched tiles) --
    bytes_weights = (params["w1"].size + params["wlat"].size
                     + params["wdec"].size) * 2
    bytes_biases = (params["b1"].size + params["blat"].size
                    + params["bdec"].size) * 4
    bytes_batched = 2 * (tb * d_pad * 2         # x tile (bf16)
                         + tb * l_pad * 2       # eps tile (bf16)
                         + tb * d_pad * 2       # recon tile (bf16)
                         + tb * 3 * l_pad * 4)  # packed latent tile (f32)
    vmem_needed = bytes_weights + bytes_biases + bytes_batched
    vmem_limit = max(16 << 20, min(int(vmem_needed * 1.3), 64 << 20))

    flops = 2 * b_pad * (d_pad * h_pad + h_pad * 2 * l_pad + l_pad * d_pad)
    bytes_accessed = (
        x_p.size * 2 + eps_p.size * 2
        + bytes_weights + bytes_biases
        + b_pad * d_pad * 2                     # recon (bf16)
        + b_pad * 3 * l_pad * 4)                # packed mu|logvar|z (f32)

    const = lambda i: (0, 0)      # weights/biases: same block every step
    batched = lambda i: (i, 0)    # batch-tiled tensors
    resident = pl.Buffered(1)     # single buffer for VMEM-resident operands

    recon_p, lat_p = pl.pallas_call(
        vae_forward_kernel,
        out_shape=(
            jax.ShapeDtypeStruct((b_pad, d_pad), jnp.bfloat16),
            jax.ShapeDtypeStruct((b_pad, 3 * l_pad), jnp.float32),
        ),
        grid_spec=pltpu.PrefetchScalarGridSpec(
            num_scalar_prefetch=0,
            grid=(nb,),
            in_specs=[
                pl.BlockSpec((tb, d_pad), batched),                    # x
                pl.BlockSpec((d_pad, h_pad), const,
                             pipeline_mode=resident),                  # w1
                pl.BlockSpec((1, h_pad), const,
                             pipeline_mode=resident),                  # b1
                pl.BlockSpec((h_pad, 2 * l_pad), const,
                             pipeline_mode=resident),                  # wlat
                pl.BlockSpec((1, 2 * l_pad), const,
                             pipeline_mode=resident),                  # blat
                pl.BlockSpec((l_pad, d_pad), const,
                             pipeline_mode=resident),                  # wdec
                pl.BlockSpec((1, d_pad), const,
                             pipeline_mode=resident),                  # bdec
                pl.BlockSpec((tb, l_pad), batched),                    # eps
            ],
            out_specs=(
                pl.BlockSpec((tb, d_pad), batched),                    # recon
                pl.BlockSpec((tb, 3 * l_pad), batched),                # mu|lv|z
            ),
        ),
        compiler_params=pltpu.CompilerParams(
            dimension_semantics=("parallel",),
            vmem_limit_bytes=vmem_limit,
        ),
        cost_estimate=pl.CostEstimate(
            flops=flops,
            transcendentals=b_pad * l_pad,
            bytes_accessed=bytes_accessed),
    )(x_p, params["w1"], params["b1"], params["wlat"], params["blat"],
      params["wdec"], params["bdec"], eps_p)

    # Slice back only when padding was added.
    recon = recon_p if (b_pad == B and d_pad == D) else recon_p[:B, :D]
    recon = recon.reshape(x_nchw.shape).astype(x_nchw.dtype)
    mu = lat_p[:B, 0 * l_pad:0 * l_pad + latent_dim]
    logvar = lat_p[:B, 1 * l_pad:1 * l_pad + latent_dim]
    z = lat_p[:B, 2 * l_pad:2 * l_pad + latent_dim]
    return recon, mu, logvar, z


def downsample_shape(shape, nb_iterations=1, scale_factor=2):
    # Pure Python/NumPy shape arithmetic — no tensor compute, no Pallas needed.
    shape = np.asarray(shape)
    all_shapes = [shape.astype(int).tolist()]
    for _ in range(nb_iterations):
        shape = np.floor(shape / scale_factor)
        all_shapes.append(shape.astype(int).tolist())
    return all_shapes


# TODO(synk): BaseVAE.encode/decode/generate/forward are abstract in the source
# module; the concrete MLP encoder/decoder above is a synthetic instantiation.

if __name__ == "__main__":
    B, C, H, W = 2, 4, 16, 16
    HIDDEN, LATENT = 32, 16
    D = C * H * W

    key = jax.random.PRNGKey(0)
    k_x, k_eps, k_params = jax.random.split(key, 3)

    x = jax.random.normal(k_x, (B, C, H, W), dtype=jnp.float32)
    eps = jax.random.normal(k_eps, (B, LATENT), dtype=jnp.float32)
    params = init_params(k_params, D, HIDDEN, LATENT)

    recon, mu, logvar, z = vae_forward(x, params, eps)
    jax.block_until_ready((recon, mu, logvar, z))

    assert recon.shape == x.shape
    assert mu.shape == (B, LATENT) and logvar.shape == (B, LATENT)
    assert z.shape == (B, LATENT)

    # Pure-JAX reference (f32 math on the bf16-quantized logical weights).
    # Kernel additionally casts h/z (and eps) to bf16 for the MXU — tolerances
    # are loose enough to absorb that (documented per review).
    l_pad = params["dims"][5]
    w1 = params["w1"][:D, :HIDDEN].astype(jnp.float32)
    wlat = params["wlat"].astype(jnp.float32)
    wmu = wlat[:HIDDEN, :LATENT]
    wlv = wlat[:HIDDEN, l_pad:l_pad + LATENT]
    wdec = params["wdec"][:LATENT, :D].astype(jnp.float32)
    xf = x.reshape(B, D)
    h_ref = jnp.maximum(xf @ w1, 0.0)
    mu_ref = h_ref @ wmu
    lv_ref = h_ref @ wlv
    z_ref = mu_ref + eps * jnp.exp(0.5 * lv_ref)
    recon_ref = (z_ref @ wdec).reshape(x.shape)
    for got, want in ((mu, mu_ref), (logvar, lv_ref), (z, z_ref),
                      (recon, recon_ref)):
        np.testing.assert_allclose(np.asarray(got, dtype=np.float32),
                                   np.asarray(want), rtol=0.1, atol=0.1)

    # sanity: downsample_shape helper behaves like the torch/numpy original
    assert downsample_shape((16, 16), nb_iterations=2) == [[16, 16], [8, 8], [4, 4]]

    print("KERNEL_OK")
</pallas_src>

<mosaic_0001>
module attributes {stable_mosaic.version = 11 : i64} {
  func.func @vae_forward_kernel(%arg0: i32, %arg1: memref<16x1024xbf16, #tpu.memory_space<vmem>>, %arg2: memref<1024x128xbf16, #tpu.memory_space<vmem>>, %arg3: memref<1x128xf32, #tpu.memory_space<vmem>>, %arg4: memref<128x256xbf16, #tpu.memory_space<vmem>>, %arg5: memref<1x256xf32, #tpu.memory_space<vmem>>, %arg6: memref<128x1024xbf16, #tpu.memory_space<vmem>>, %arg7: memref<1x1024xf32, #tpu.memory_space<vmem>>, %arg8: memref<16x128xbf16, #tpu.memory_space<vmem>>, %arg9: memref<16x1024xbf16, #tpu.memory_space<vmem>>, %arg10: memref<16x384xf32, #tpu.memory_space<vmem>>) attributes {dimension_semantics = [#tpu.dimension_semantics<parallel>], iteration_bounds = array<i64: 1>, scalar_prefetch = 0 : i64, scratch_operands = 0 : i64, tpu.core_type = #tpu.core_type<tc>, window_params = [{transform_indices = @transform_0, window_bounds = array<i64: 16, 1024>}, {pipeline_mode = #tpu.pipeline_mode<synchronous>, transform_indices = @transform_1, window_bounds = array<i64: 1024, 128>}, {pipeline_mode = #tpu.pipeline_mode<synchronous>, transform_indices = @transform_2, window_bounds = array<i64: 1, 128>}, {pipeline_mode = #tpu.pipeline_mode<synchronous>, transform_indices = @transform_3, window_bounds = array<i64: 128, 256>}, {pipeline_mode = #tpu.pipeline_mode<synchronous>, transform_indices = @transform_4, window_bounds = array<i64: 1, 256>}, {pipeline_mode = #tpu.pipeline_mode<synchronous>, transform_indices = @transform_5, window_bounds = array<i64: 128, 1024>}, {pipeline_mode = #tpu.pipeline_mode<synchronous>, transform_indices = @transform_6, window_bounds = array<i64: 1, 1024>}, {transform_indices = @transform_7, window_bounds = array<i64: 16, 128>}, {transform_indices = @transform_8, window_bounds = array<i64: 16, 1024>}, {transform_indices = @transform_9, window_bounds = array<i64: 16, 384>}]} {
    %c0 = arith.constant 0 : index
    %c0_0 = arith.constant 0 : index
    %0 = vector.load %arg1[%c0, %c0_0] : memref<16x1024xbf16, #tpu.memory_space<vmem>>, vector<16x1024xbf16>
    %c0_1 = arith.constant 0 : index
    %c0_2 = arith.constant 0 : index
    %1 = vector.load %arg2[%c0_1, %c0_2] : memref<1024x128xbf16, #tpu.memory_space<vmem>>, vector<1024x128xbf16>
    %cst = arith.constant dense<0.000000e+00> : vector<16x128xf32>
    %2 = tpu.matmul %0, %1, %cst {dimension_numbers = #tpu.dot_dimension_numbers<[1], [0], [0], [1], [0, 0, 1, 1], [], []>} : vector<16x1024xbf16>, vector<1024x128xbf16>, vector<16x128xf32> -> vector<16x128xf32>
    %c0_3 = arith.constant 0 : index
    %c0_4 = arith.constant 0 : index
    %3 = vector.load %arg3[%c0_3, %c0_4] : memref<1x128xf32, #tpu.memory_space<vmem>>, vector<1x128xf32>
    %4 = vector.broadcast %3 : vector<1x128xf32> to vector<16x128xf32>
    %5 = arith.addf %2, %4 : vector<16x128xf32>
    %cst_5 = arith.constant 0.000000e+00 : f32
    %6 = vector.broadcast %cst_5 : f32 to vector<16x128xf32>
    %7 = arith.maximumf %5, %6 : vector<16x128xf32>
    %8 = arith.truncf %7 : vector<16x128xf32> to vector<16x128xbf16>
    %c0_6 = arith.constant 0 : index
    %c0_7 = arith.constant 0 : index
    %9 = vector.load %arg4[%c0_6, %c0_7] : memref<128x256xbf16, #tpu.memory_space<vmem>>, vector<128x256xbf16>
    %cst_8 = arith.constant dense<0.000000e+00> : vector<16x256xf32>
    %10 = tpu.matmul %8, %9, %cst_8 {dimension_numbers = #tpu.dot_dimension_numbers<[1], [0], [0], [1], [0, 0, 1, 1], [], []>} : vector<16x128xbf16>, vector<128x256xbf16>, vector<16x256xf32> -> vector<16x256xf32>
    %c0_9 = arith.constant 0 : index
    %c0_10 = arith.constant 0 : index
    %11 = vector.load %arg5[%c0_9, %c0_10] : memref<1x256xf32, #tpu.memory_space<vmem>>, vector<1x256xf32>
    %12 = vector.broadcast %11 : vector<1x256xf32> to vector<16x256xf32>
    %13 = arith.addf %10, %12 : vector<16x256xf32>
    %14 = vector.extract_strided_slice %13 {offsets = [0, 0], sizes = [16, 128], strides = [1, 1]} : vector<16x256xf32> to vector<16x128xf32>
    %15 = vector.extract_strided_slice %13 {offsets = [0, 128], sizes = [16, 128], strides = [1, 1]} : vector<16x256xf32> to vector<16x128xf32>
    %c0_11 = arith.constant 0 : index
    %c0_12 = arith.constant 0 : index
    %16 = vector.load %arg8[%c0_11, %c0_12] : memref<16x128xbf16, #tpu.memory_space<vmem>>, vector<16x128xbf16>
    %17 = arith.extf %16 : vector<16x128xbf16> to vector<16x128xf32>
    %cst_13 = arith.constant 5.000000e-01 : f32
    %18 = vector.broadcast %cst_13 : f32 to vector<16x128xf32>
    %19 = arith.mulf %18, %15 : vector<16x128xf32>
    %20 = math.exp %19 : vector<16x128xf32>
    %21 = arith.mulf %17, %20 : vector<16x128xf32>
    %22 = arith.addf %14, %21 : vector<16x128xf32>
    %23 = arith.truncf %22 : vector<16x128xf32> to vector<16x128xbf16>
    %c0_14 = arith.constant 0 : index
    %c0_15 = arith.constant 0 : index
    %24 = vector.load %arg6[%c0_14, %c0_15] : memref<128x1024xbf16, #tpu.memory_space<vmem>>, vector<128x1024xbf16>
    %cst_16 = arith.constant dense<0.000000e+00> : vector<16x1024xf32>
    %25 = tpu.matmul %23, %24, %cst_16 {dimension_numbers = #tpu.dot_dimension_numbers<[1], [0], [0], [1], [0, 0, 1, 1], [], []>} : vector<16x128xbf16>, vector<128x1024xbf16>, vector<16x1024xf32> -> vector<16x1024xf32>
    %c0_17 = arith.constant 0 : index
    %c0_18 = arith.constant 0 : index
    %26 = vector.load %arg7[%c0_17, %c0_18] : memref<1x1024xf32, #tpu.memory_space<vmem>>, vector<1x1024xf32>
    %27 = vector.broadcast %26 : vector<1x1024xf32> to vector<16x1024xf32>
    %28 = arith.addf %25, %27 : vector<16x1024xf32>
    %29 = arith.truncf %28 : vector<16x1024xf32> to vector<16x1024xbf16>
    %c0_19 = arith.constant 0 : index
    %c0_20 = arith.constant 0 : index
    %30 = vector.load %arg9[%c0_19, %c0_20] : memref<16x1024xbf16, #tpu.memory_space<vmem>>, vector<16x1024xbf16>
    tpu.vector_store %arg9[%c0_19, %c0_20], %29 {strides = array<i32>} : memref<16x1024xbf16, #tpu.memory_space<vmem>>, vector<16x1024xbf16>,
    %31 = tpu.concatenate %14, %15, %22 in 1 : vector<16x128xf32>, vector<16x128xf32>, vector<16x128xf32> -> vector<16x384xf32>
    %c0_21 = arith.constant 0 : index
    %c0_22 = arith.constant 0 : index
    %32 = vector.load %arg10[%c0_21, %c0_22] : memref<16x384xf32, #tpu.memory_space<vmem>>, vector<16x384xf32>
    tpu.vector_store %arg10[%c0_21, %c0_22], %31 {strides = array<i32>} : memref<16x384xf32, #tpu.memory_space<vmem>>, vector<16x384xf32>,
    return
  }
  func.func @transform_0(%arg0: i32) -> (i32, i32) {
    %c0_i32 = arith.constant 0 : i32
    %c0_i32_0 = arith.constant 0 : i32
    return %arg0, %c0_i32 : i32, i32
  }
  func.func @transform_1(%arg0: i32) -> (i32, i32) {
    %c0_i32 = arith.constant 0 : i32
    %c0_i32_0 = arith.constant 0 : i32
    %c0_i32_1 = arith.constant 0 : i32
    return %c0_i32, %c0_i32_0 : i32, i32
  }
  func.func @transform_2(%arg0: i32) -> (i32, i32) {
    %c0_i32 = arith.constant 0 : i32
    %c0_i32_0 = arith.constant 0 : i32
    %c0_i32_1 = arith.constant 0 : i32
    return %c0_i32, %c0_i32_0 : i32, i32
  }
  func.func @transform_3(%arg0: i32) -> (i32, i32) {
    %c0_i32 = arith.constant 0 : i32
    %c0_i32_0 = arith.constant 0 : i32
    %c0_i32_1 = arith.constant 0 : i32
    return %c0_i32, %c0_i32_0 : i32, i32
  }
  func.func @transform_4(%arg0: i32) -> (i32, i32) {
    %c0_i32 = arith.constant 0 : i32
    %c0_i32_0 = arith.constant 0 : i32
    %c0_i32_1 = arith.constant 0 : i32
    return %c0_i32, %c0_i32_0 : i32, i32
  }
  func.func @transform_5(%arg0: i32) -> (i32, i32) {
    %c0_i32 = arith.constant 0 : i32
    %c0_i32_0 = arith.constant 0 : i32
    %c0_i32_1 = arith.constant 0 : i32
    return %c0_i32, %c0_i32_0 : i32, i32
  }
  func.func @transform_6(%arg0: i32) -> (i32, i32) {
    %c0_i32 = arith.constant 0 : i32
    %c0_i32_0 = arith.constant 0 : i32
    %c0_i32_1 = arith.constant 0 : i32
    return %c0_i32, %c0_i32_0 : i32, i32
  }
  func.func @transform_7(%arg0: i32) -> (i32, i32) {
    %c0_i32 = arith.constant 0 : i32
    %c0_i32_0 = arith.constant 0 : i32
    return %arg0, %c0_i32 : i32, i32
  }
  func.func @transform_8(%arg0: i32) -> (i32, i32) {
    %c0_i32 = arith.constant 0 : i32
    %c0_i32_0 = arith.constant 0 : i32
    return %arg0, %c0_i32 : i32, i32
  }
  func.func @transform_9(%arg0: i32) -> (i32, i32) {
    %c0_i32 = arith.constant 0 : i32
    %c0_i32_0 = arith.constant 0 : i32
    return %arg0, %c0_i32 : i32, i32
  }
}

</mosaic_0001>

<bundles_post_ra>
// kernel: tpu_custom_call.1
= control target key start
LH: loop header
LB: loop body
LE: loop exit
PB: predicated region body
PF: predicated region fallthrough
CT: control target
= control target key end

     0   :  { %15 = vsyncpa [#allocation3], 0  ;;  %s2447_s0 = inlined_call_operand.hbm [shape: bf16[16,1024], index: 0, kind: input, shape index: {}]   ;;  %s2448_s1 = inlined_call_operand.hbm [shape: bf16[1024,128], index: 1, kind: input, shape index: {}]   ;;  %s2449_s2 = inlined_call_operand.hbm [shape: f32[1,128], index: 2, kind: input, shape index: {}]   ;;  %s2450_s3 = inlined_call_operand.hbm [shape: bf16[128,256], index: 3, kind: input, shape index: {}]   ;;  %s2451_s4 = inlined_call_operand.vmem [shape: f32[1,256], index: 4, kind: input, shape index: {}]   ;;  %s2452_s5 = inlined_call_operand.hbm [shape: bf16[128,1024], index: 5, kind: input, shape index: {}]   ;;  %s2453_s6 = inlined_call_operand.vmem [shape: f32[1,1024], index: 6, kind: input, shape index: {}]   ;;  %s2454_s7 = inlined_call_operand.vmem [shape: bf16[16,128], index: 7, kind: input, shape index: {}]   ;;  %s2455_s8 = inlined_call_operand.hbm [shape: bf16[16,1024], index: 8, kind: output, shape index: {0}]   ;;  %s2456_s9 = inlined_call_operand.hbm [shape: f32[16,384], index: 9, kind: output, shape index: {1}]  }
   0x1   :  { %16 = vsyncpa [#allocation6], 0 }
   0x2   :  { %17 = vsyncpa [#allocation9], 0 }
   0x3   :  { %18 = vsyncpa [#allocation4], 0 }
   0x4   :  { %19 = vsyncpa [#allocation13], 0  ;;  %s2228_s30 = smov [#allocation5]   ;;  %s2064_s13 = scalar_lea.hbm %s2448_s1, 8192 }
   0x5   :  { %s37_s10 = sshll.u32 %s2228_s30, 4  ;;  %p2065_p0 = scmp.ne.s32.totalorder %s2448_s1, %s2064_s13  ;;  %s38_s10 = int_to_ptr.vmem [resolvable:$true] %s37_s10 }
   0x6   :  { %p2068_p1 = scmp.lt.u32.totalorder %s2064_s13, %s2448_s1 }
   0x8   :  { %p2070_p2 = pnand %p2068_p1, %p2065_p0 }
   0xa   :  { %2073 = shalt.err (!%p2070_p2)
}
   0xb   :  { %s2074_s18 = scalar_lea.vmem %s38_s10, 8192  ;;  %p2079_p4 = scmp.lt.s32.totalorder %s38_s10, %s38_s10 }
   0xc   :  { %p2075_p3 = scmp.ne.s32.totalorder %s38_s10, %s2074_s18  ;;  %p2080_p5 = scmp.lt.s32.totalorder %s2074_s18, %s2074_s18 }
   0xe   :  { %p2081_p6 = por %p2080_p5, %p2079_p4 }
  0x10   :  { %p2082_p7 = pnand %p2081_p6, %p2075_p3 }
  0x12   :  { %2085 = shalt.err (!%p2082_p7)
}
  0x13   :  { %s2229_s19 = smov 64   ;;  %s2230_s20 = smov 4  }
  0x14   :  { %43 = dma.hbm_to_vmem [thread:$0]  %s2448_s1, 8192, %s38_s10, [#allocation6], %s2229_s19, %s2229_s19, %s2230_s20  }
  0x15   :  { %s2231_s23 = smov [#allocation8]   ;;  %s2086_s27 = scalar_lea.hbm %s2450_s3, 2048 }
  0x16   :  { %s59_s24 = sshll.u32 %s2231_s23, 4  ;;  %p2087_p8 = scmp.ne.s32.totalorder %s2450_s3, %s2086_s27  ;;  %s60_s24 = int_to_ptr.vmem [resolvable:$true] %s59_s24 }
  0x17   :  { %p2090_p9 = scmp.lt.u32.totalorder %s2086_s27, %s2450_s3 }
  0x19   :  { %p2092_p10 = pnand %p2090_p9, %p2087_p8 }
  0x1b   :  { %2095 = shalt.err (!%p2092_p10)
}
  0x1c   :  { %s2096_s12 = scalar_lea.vmem %s60_s24, 2048  ;;  %p2101_p12 = scmp.lt.s32.totalorder %s60_s24, %s60_s24 }
  0x1d   :  { %p2097_p11 = scmp.ne.s32.totalorder %s60_s24, %s2096_s12  ;;  %p2102_p13 = scmp.lt.s32.totalorder %s2096_s12, %s2096_s12 }
  0x1f   :  { %p2103_p0 = por %p2102_p13, %p2101_p12 }
  0x21   :  { %p2104_p1 = pnand %p2103_p0, %p2097_p11 }
  0x23   :  { %2107 = shalt.err (!%p2104_p1)
}
  0x24   :  { %s2232_s1 = smov 128   ;;  %s2233_s10 = smov 8  }
  0x25   :  { %65 = dma.hbm_to_vmem [thread:$0]  %s2450_s3, 2048, %s60_s24, [#allocation9], %s2232_s1, %s2232_s1, %s2233_s10  }
  0x26   :  { %s2234_s15 = smov [#allocation2]   ;;  %s2108_s19 = scalar_lea.hbm %s2447_s0, 1024 }
  0x27   :  { %s25_s16 = sshll.u32 %s2234_s15, 4  ;;  %p2109_p2 = scmp.ne.s32.totalorder %s2447_s0, %s2108_s19  ;;  %s26_s16 = int_to_ptr.vmem [resolvable:$true] %s25_s16 }
  0x28   :  { %p2112_p3 = scmp.lt.u32.totalorder %s2108_s19, %s2447_s0 }
  0x2a   :  { %p2114_p4 = pnand %p2112_p3, %p2109_p2 }
  0x2c   :  { %2117 = shalt.err (!%p2114_p4)
}
  0x2d   :  { %s2118_s25 = scalar_lea.vmem %s26_s16, 1024  ;;  %p2123_p6 = scmp.lt.s32.totalorder %s26_s16, %s26_s16 }
  0x2e   :  { %p2119_p5 = scmp.ne.s32.totalorder %s26_s16, %s2118_s25  ;;  %p2124_p7 = scmp.lt.s32.totalorder %s2118_s25, %s2118_s25 }
  0x30   :  { %p2125_p8 = por %p2124_p7, %p2123_p6 }
  0x32   :  { %p2126_p9 = pnand %p2125_p8, %p2119_p5 }
  0x34   :  { %2129 = shalt.err (!%p2126_p9)
}
  0x35   :  { %s2235_s3 = smov 512   ;;  %s2236_s24 = smov 32  }
  0x36   :  { %31 = dma.hbm_to_vmem [thread:$0]  %s2447_s0, 1024, %s26_s16, [#allocation3], %s2235_s3, %s2235_s3, %s2236_s24  }
  0x37   :  { %s2237_s28 = smov [#allocation7]   ;;  %s2238_s30 = smov [#allocation10]  }
  0x38   :  { %s50_s29 = sshll.u32 %s2237_s28, 4  ;;  %s73_s11 = sshll.u32 %s2238_s30, 4  ;;  %s51_s29 = int_to_ptr.vmem [resolvable:$true] %s50_s29  ;;  %s74_s11 = int_to_ptr.vmem [resolvable:$true] %s73_s11 }
  0x39   :  { %s2130_s10 = scalar_lea.hbm %s2449_s2, 16 }
  0x3a   :  { %p2131_p10 = scmp.ne.s32.totalorder %s2449_s2, %s2130_s10  ;;  %p2134_p11 = scmp.lt.u32.totalorder %s2130_s10, %s2449_s2 }
  0x3c   :  { %p2136_p12 = pnand %p2134_p11, %p2131_p10 }
  0x3e   :  { %2139 = shalt.err (!%p2136_p12)
}
  0x3f   :  { %s2140_s0 = scalar_lea.vmem %s51_s29, 16  ;;  %s2144_s16 = scalar_lea.vmem %s51_s29, 32 }
  0x40   :  { %p2141_p13 = scmp.ne.s32.totalorder %s51_s29, %s2140_s0  ;;  %p2145_p0 = scmp.lt.s32.totalorder %s51_s29, %s51_s29 }
  0x41   :  { %p2146_p1 = scmp.lt.s32.totalorder %s2144_s16, %s2140_s0 }
  0x43   :  { %p2147_p2 = por %p2146_p1, %p2145_p0 }
  0x45   :  { %p2148_p3 = pnand %p2147_p2, %p2141_p13 }
  0x47   :  { %2151 = shalt.err (!%p2148_p3)
}
  0x48   :  { %53 = dma.hbm_to_vmem [thread:$0]  %s2449_s2, 16, %s51_s29, [#allocation6]  }
  0x49   :  { %s2152_s22 = scalar_lea.hbm %s2452_s5, 8192 }
  0x4a   :  { %p2153_p4 = scmp.ne.s32.totalorder %s2452_s5, %s2152_s22  ;;  %p2156_p5 = scmp.lt.u32.totalorder %s2152_s22, %s2452_s5 }
  0x4c   :  { %p2158_p6 = pnand %p2156_p5, %p2153_p4 }
  0x4e   :  { %2161 = shalt.err (!%p2158_p6)
}
  0x4f   :  { %s2162_s28 = scalar_lea.vmem %s74_s11, 8192  ;;  %p2167_p8 = scmp.lt.s32.totalorder %s74_s11, %s74_s11 }
  0x50   :  { %p2163_p7 = scmp.ne.s32.totalorder %s74_s11, %s2162_s28  ;;  %p2168_p9 = scmp.lt.s32.totalorder %s2162_s28, %s2162_s28 }
  0x52   :  { %p2169_p10 = por %p2168_p9, %p2167_p8 }
  0x54   :  { %p2170_p11 = pnand %p2169_p10, %p2163_p7 }
  0x56   :  { %2173 = shalt.err (!%p2170_p11)
}
  0x57   :  { %79 = dma.hbm_to_vmem [thread:$0]  %s2452_s5, 8192, %s74_s11, [#allocation9], %s2235_s3, %s2235_s3, %s2236_s24  }
  0x58   :  { %2218 = dma.done.wait [#allocation3], 1024  }
  0x59   :  { %2219 = vsyncadd [#allocation3], 4294966272 }
  0x5a   :  { %2220 = dma.done.wait [#allocation6], 8208  }
  0x5b   :  { %2221 = vsyncadd [#allocation6], 4294959088 }
  0x5c   :  { %2222 = dma.done.wait [#allocation9], 10240  }
  0x5d   :  { %2223 = vsyncadd [#allocation9], 4294957056  ;;  %v1972_v0 = vld [vmem:[#allocation5 + $0x40] sm:$0xff]   ;;  %v1976_v4 = vld [vmem:[#allocation5 + $0x48] sm:$0xff]  }
  0x5e   :  { %v1973_v1 = vld [vmem:[#allocation5 + $0xc0] sm:$0xff]   ;;  %1868 = vmatprep.subr.bf16.mxu0 %v1972_v0  ;;  %v1977_v5 = vld [vmem:[#allocation5 + $0xc8] sm:$0xff]   ;;  %v1980_v8 = vld [vmem:[#allocation5 + $0x50] sm:$0xff]  }
  0x5f   :  { %v1974_v2 = vld [vmem:[#allocation5] sm:$0xff]   ;;  %1890 = vmatprep.subr.bf16.mxu1 %v1973_v1  ;;  %v1978_v6 = vld [vmem:[#allocation5 + $0x8] sm:$0xff]   ;;  %v1981_v9 = vld [vmem:[#allocation5 + $0xd0] sm:$0xff]  }
  0x60   :  { %v1975_v3 = vld [vmem:[#allocation5 + $0x80] sm:$0xff]   ;;  %1869 = vmatpush3.bf16.msra.mxu0 %v1974_v2  ;;  %v1979_v7 = vld [vmem:[#allocation5 + $0x88] sm:$0xff]   ;;  %v1982_v10 = vld [vmem:[#allocation5 + $0x10] sm:$0xff]  }
  0x61   :  { %1891 = vmatpush3.bf16.msra.mxu1 %v1975_v3  ;;  %1870 = vmatprep.subr.bf16.mxu0 %v1976_v4  ;;  %v1983_v11 = vld [vmem:[#allocation5 + $0x90] sm:$0xff]   ;;  %v1984_v12 = vld [vmem:[#allocation5 + $0x58] sm:$0xff]   ;;  %v1988_v16 = vld [vmem:[#allocation5 + $0x60] sm:$0xff]  }
  0x62   :  { %1892 = vmatprep.subr.bf16.mxu1 %v1977_v5  ;;  %v1985_v13 = vld [vmem:[#allocation5 + $0xd8] sm:$0xff]   ;;  %v1989_v17 = vld [vmem:[#allocation5 + $0xe0] sm:$0xff]   ;;  %v1992_v20 = vld [vmem:[#allocation5 + $0x68] sm:$0xff]  }
  0x63   :  { %v1986_v14 = vld [vmem:[#allocation5 + $0x18] sm:$0xff]   ;;  %v1990_v18 = vld [vmem:[#allocation5 + $0x20] sm:$0xff]   ;;  %v1993_v21 = vld [vmem:[#allocation5 + $0xe8] sm:$0xff]  }
  0x64   :  { %1871 = vmatpush3.bf16.msra.mxu0 %v1978_v6  ;;  %v1987_v15 = vld [vmem:[#allocation5 + $0x98] sm:$0xff]   ;;  %v1991_v19 = vld [vmem:[#allocation5 + $0xa0] sm:$0xff]   ;;  %v1994_v22 = vld [vmem:[#allocation5 + $0x28] sm:$0xff]  }
  0x65   :  { %1893 = vmatpush3.bf16.msra.mxu1 %v1979_v7  ;;  %1872 = vmatprep.subr.bf16.mxu0 %v1980_v8  ;;  %v1995_v23 = vld [vmem:[#allocation5 + $0xa8] sm:$0xff]   ;;  %v1996_v24 = vld [vmem:[#allocation5 + $0x70] sm:$0xff]   ;;  %v2000_v28 = vld [vmem:[#allocation5 + $0x78] sm:$0xff]  }
  0x66   :  { %1894 = vmatprep.subr.bf16.mxu1 %v1981_v9  ;;  %v1997_v25 = vld [vmem:[#allocation5 + $0xf0] sm:$0xff]   ;;  %v2001_v29 = vld [vmem:[#allocation5 + $0xf8] sm:$0xff]   ;;  %v100_v32 = vld [vmem:[#allocation2] sm:$0xff] }
  0x67   :  { %v1998_v26 = vld [vmem:[#allocation5 + $0x30] sm:$0xff]   ;;  %v2002_v30 = vld [vmem:[#allocation5 + $0x38] sm:$0xff]   ;;  %v104_v33 = vld [vmem:[#allocation2 + $0x20] sm:$0xff] }
  0x68   :  { %1873 = vmatpush3.bf16.msra.mxu0 %v1982_v10  ;;  %v1999_v27 = vld [vmem:[#allocation5 + $0xb0] sm:$0xff]   ;;  %v2003_v31 = vld [vmem:[#allocation5 + $0xb8] sm:$0xff]   ;;  %v101_v34 = vld [vmem:[#allocation2 + $0x8] sm:$0xff]  ;;  %v1696_v35 = vcombine.low %v100_v32, %v104_v33  ;;  %v1697_v36 = vcombine.high %v100_v32, %v104_v33  ;;  %v2239_v32 = vmov 0  }
  0x69   :  { %1895 = vmatpush3.bf16.msra.mxu1 %v1983_v11  ;;  %1874 = vmatprep.subr.bf16.mxu0 %v1984_v12  ;;  %v105_v37 = vld [vmem:[#allocation2 + $0x28] sm:$0xff]  ;;  %v2004_v40 = vld [vmem:[#allocation5 + $0x140] sm:$0xff]   ;;  %v2012_v48 = vld [vmem:[#allocation5 + $0x150] sm:$0xff]  }
  0x6a   :  { %1896 = vmatprep.subr.bf16.mxu1 %v1985_v13  ;;  %v1698_v38 = vcombine.low %v101_v34, %v105_v37  ;;  %v1699_v39 = vcombine.high %v101_v34, %v105_v37  ;;  %699 = vmatprep.mubr.bf16.mxu0 %v1697_v36  ;;  %v2005_v41 = vld [vmem:[#allocation5 + $0x1c0] sm:$0xff]   ;;  %v2008_v44 = vld [vmem:[#allocation5 + $0x148] sm:$0xff]   ;;  %v2013_v49 = vld [vmem:[#allocation5 + $0x1d0] sm:$0xff]  }
  0x6b   :  { %v2006_v42 = vld [vmem:[#allocation5 + $0x100] sm:$0xff]   ;;  %v2009_v45 = vld [vmem:[#allocation5 + $0x1c8] sm:$0xff]   ;;  %v2014_v50 = vld [vmem:[#allocation5 + $0x110] sm:$0xff]  }
  0x6c   :  { %1875 = vmatpush3.bf16.msra.mxu0 %v1986_v14  ;;  %740 = vmatprep.mubr.bf16.mxu1 %v1699_v39  ;;  %v2007_v43 = vld [vmem:[#allocation5 + $0x180] sm:$0xff]   ;;  %v2010_v46 = vld [vmem:[#allocation5 + $0x108] sm:$0xff]   ;;  %v2015_v51 = vld [vmem:[#allocation5 + $0x190] sm:$0xff]  }
  0x6d   :  { %1897 = vmatpush3.bf16.msra.mxu1 %v1987_v15  ;;  %1876 = vmatprep.subr.bf16.mxu0 %v1988_v16  ;;  %v2011_v47 = vld [vmem:[#allocation5 + $0x188] sm:$0xff]   ;;  %v2016_v52 = vld [vmem:[#allocation5 + $0x158] sm:$0xff]   ;;  %v2020_v56 = vld [vmem:[#allocation5 + $0x160] sm:$0xff]  }
  0x6e   :  { %1898 = vmatprep.subr.bf16.mxu1 %v1989_v17  ;;  %v2017_v53 = vld [vmem:[#allocation5 + $0x1d8] sm:$0xff]   ;;  %v2021_v57 = vld [vmem:[#allocation5 + $0x1e0] sm:$0xff]   ;;  %v2024_v60 = vld [vmem:[#allocation5 + $0x168] sm:$0xff]  }
  0x6f   :  { %v2018_v54 = vld [vmem:[#allocation5 + $0x118] sm:$0xff]   ;;  %v2022_v58 = vld [vmem:[#allocation5 + $0x120] sm:$0xff]   ;;  %v2025_v61 = vld [vmem:[#allocation5 + $0x1e8] sm:$0xff]  }
  0x70   :  { %1877 = vmatpush3.bf16.msra.mxu0 %v1990_v18  ;;  %v2019_v55 = vld [vmem:[#allocation5 + $0x198] sm:$0xff]   ;;  %v2023_v59 = vld [vmem:[#allocation5 + $0x1a0] sm:$0xff]   ;;  %v2026_v62 = vld [vmem:[#allocation5 + $0x128] sm:$0xff]  }
  0x71   :  { %1899 = vmatpush3.bf16.msra.mxu1 %v1991_v19  ;;  %1878 = vmatprep.subr.bf16.mxu0 %v1992_v20  ;;  %v2027_v63 = vld [vmem:[#allocation5 + $0x1a8] sm:$0xff]   ;;  %v2028_v0 = vld [vmem:[#allocation5 + $0x170] sm:$0xff]   ;;  %v2032_v4 = vld [vmem:[#allocation5 + $0x178] sm:$0xff]  }
  0x72   :  { %1900 = vmatprep.subr.bf16.mxu1 %v1993_v21  ;;  %v2029_v1 = vld [vmem:[#allocation5 + $0x1f0] sm:$0xff]   ;;  %v2033_v5 = vld [vmem:[#allocation5 + $0x1f8] sm:$0xff]   ;;  %v2036_v16 = vld [vmem:[#allocation8] ss:$8 sps:$4 sm:$0xff]  }
  0x73   :  { %v2030_v2 = vld [vmem:[#allocation5 + $0x130] sm:$0xff]   ;;  %v2034_v6 = vld [vmem:[#allocation5 + $0x138] sm:$0xff]   ;;  %v2042_v21 = vld [vmem:[#allocation8 + $0x20] ss:$8 sps:$4 sm:$0xff]  }
  0x74   :  { %1879 = vmatpush3.bf16.msra.mxu0 %v1994_v22  ;;  %v2031_v3 = vld [vmem:[#allocation5 + $0x1b0] sm:$0xff]   ;;  %v2035_v7 = vld [vmem:[#allocation5 + $0x1b8] sm:$0xff]   ;;  %v1000_v33 = vld [vmem:[#allocation10] sm:$0xff] }
  0x75   :  { %1901 = vmatpush3.bf16.msra.mxu1 %v1995_v23  ;;  %1880 = vmatprep.subr.bf16.mxu0 %v1996_v24  ;;  %v102_v8 = vld [vmem:[#allocation2 + $0x10] sm:$0xff]  ;;  %v103_v12 = vld [vmem:[#allocation2 + $0x18] sm:$0xff]  ;;  %v1004_v34 = vld [vmem:[#allocation10 + $0x20] sm:$0xff] }
  0x76   :  { %1902 = vmatprep.subr.bf16.mxu1 %v1997_v25  ;;  %v106_v9 = vld [vmem:[#allocation2 + $0x30] sm:$0xff]  ;;  %v107_v13 = vld [vmem:[#allocation2 + $0x38] sm:$0xff]  ;;  %v2048_v25 = vld [vmem:[#allocation8 + $0x40] ss:$8 sps:$4 sm:$0xff]   ;;  %v1784_v36 = vcombine.low %v1000_v33, %v1004_v34  ;;  %v1785_v37 = vcombine.high %v1000_v33, %v1004_v34 }
  0x77   :  { %v1700_v10 = vcombine.low %v102_v8, %v106_v9  ;;  %v1701_v11 = vcombine.high %v102_v8, %v106_v9  ;;  %v1702_v14 = vcombine.low %v103_v12, %v107_v13  ;;  %v1703_v15 = vcombine.high %v103_v12, %v107_v13  ;;  %v2038_v17 = vld [vmem:[#allocation8 + $0x4] ss:$8 sps:$4 sm:$0xff]   ;;  %v2041_v18 = vld [vmem:[#allocation8 + $0x14] ss:$8 sps:$4 sm:$0xff]   ;;  %v2039_v19 = vld [vmem:[#allocation8 + $0x10] ss:$8 sps:$4 sm:$0xff]  }
  0x78   :  { %1881 = vmatpush3.bf16.msra.mxu0 %v1998_v26  ;;  %v2044_v20 = vld [vmem:[#allocation8 + $0x24] ss:$8 sps:$4 sm:$0xff]   ;;  %v2047_v22 = vld [vmem:[#allocation8 + $0x34] ss:$8 sps:$4 sm:$0xff]   ;;  %v2045_v23 = vld [vmem:[#allocation8 + $0x30] ss:$8 sps:$4 sm:$0xff]  }
  0x79   :  { %1903 = vmatpush3.bf16.msra.mxu1 %v1999_v27  ;;  %1882 = vmatprep.subr.bf16.mxu0 %v2000_v28  ;;  %v2050_v24 = vld [vmem:[#allocation8 + $0x44] ss:$8 sps:$4 sm:$0xff]   ;;  %v2053_v26 = vld [vmem:[#allocation8 + $0x54] ss:$8 sps:$4 sm:$0xff]   ;;  %v2051_v27 = vld [vmem:[#allocation8 + $0x50] ss:$8 sps:$4 sm:$0xff]  }
  0x7a   :  { %1904 = vmatprep.subr.bf16.mxu1 %v2001_v29  ;;  %v2056_v28 = vld [vmem:[#allocation8 + $0x64] ss:$8 sps:$4 sm:$0xff]   ;;  %v2054_v29 = vld [vmem:[#allocation8 + $0x60] ss:$8 sps:$4 sm:$0xff]  }
  0x7b   :  { %v1008_v39 = vld [vmem:[#allocation10 + $0x40] sm:$0xff]  ;;  %v1029_v34 = vld [vmem:[#allocation10 + $0xe8] sm:$0xff] }
  0x7c   :  { %1883 = vmatpush3.bf16.msra.mxu0 %v2002_v30  ;;  %v2059_v30 = vld [vmem:[#allocation8 + $0x74] ss:$8 sps:$4 sm:$0xff]  }
  0x7d   :  { %1905 = vmatpush3.bf16.msra.mxu1 %v2003_v31  ;;  %1912 = vmatprep.subr.bf16.mxu0 %v2004_v40  ;;  %v2057_v31 = vld [vmem:[#allocation8 + $0x70] ss:$8 sps:$4 sm:$0xff]   ;;  %v1012_v40 = vld [vmem:[#allocation10 + $0x60] sm:$0xff] }
  0x7e   :  { %1934 = vmatprep.subr.bf16.mxu1 %v2005_v41 }
  0x7f   :  { %700 = vmatmul.mubr.bf16.vlgmr.msra.gmra.mrb[0].mxu0 %v1696_v35  ;;  %v1001_v35 = vld [vmem:[#allocation10 + $0x8] sm:$0xff] }
  0x80   :  { %741 = vmatmul.mubr.bf16.vlgmr.msra.gmra.mrb[0].mxu1 %v1698_v38  ;;  %1913 = vmatpush3.bf16.msra.mxu0 %v2006_v42  ;;  %v1005_v38 = vld [vmem:[#allocation10 + $0x28] sm:$0xff] }
  0x81   :  { %1935 = vmatpush3.bf16.msra.mxu1 %v2007_v43  ;;  %1914 = vmatprep.subr.bf16.mxu0 %v2008_v44  ;;  %v1786_v41 = vcombine.low %v1001_v35, %v1005_v38  ;;  %v1787_v42 = vcombine.high %v1001_v35, %v1005_v38  ;;  %v1793_v43 = vcombine.high %v1008_v39, %v1012_v40  ;;  %v1032_v38 = vld [vmem:[#allocation10 + $0x100] sm:$0xff] }
  0x82   :  { %1936 = vmatprep.subr.bf16.mxu1 %v2009_v45  ;;  %781 = vmatprep.mubr.bf16.mxu0 %v1701_v11  ;;  %v1792_v44 = vcombine.low %v1008_v39, %v1012_v40  ;;  %v1036_v39 = vld [vmem:[#allocation10 + $0x120] sm:$0xff]  ;;  %v1033_v40 = vld [vmem:[#allocation10 + $0x108] sm:$0xff] }
  0x83   :  { %822 = vmatprep.mubr.bf16.mxu1 %v1703_v15  ;;  %v1013_v15 = vld [vmem:[#allocation10 + $0x68] sm:$0xff] }
  0x84   :  { %1915 = vmatpush3.bf16.msra.mxu0 %v2010_v46 }
  0x85   :  { %1937 = vmatpush3.bf16.msra.mxu1 %v2011_v47  ;;  %1916 = vmatprep.subr.bf16.mxu0 %v2012_v48  ;;  %v1695_v47 = vld [vmem:[#allocation7] ss:$0 sm:$0xff] }
  0x86   :  { %1938 = vmatprep.subr.bf16.mxu1 %v2013_v49 }
  0x88   :  { %1917 = vmatpush3.bf16.msra.mxu0 %v2014_v50 }
  0x89   :  { %1939 = vmatpush3.bf16.msra.mxu1 %v2015_v51  ;;  %1918 = vmatprep.subr.bf16.mxu0 %v2016_v52 }
  0x8a   :  { %1940 = vmatprep.subr.bf16.mxu1 %v2017_v53 }
  0x8c   :  { %1919 = vmatpush3.bf16.msra.mxu0 %v2018_v54 }
  0x8d   :  { %1941 = vmatpush3.bf16.msra.mxu1 %v2019_v55  ;;  %1920 = vmatprep.subr.bf16.mxu0 %v2020_v56 }
  0x8e   :  { %1942 = vmatprep.subr.bf16.mxu1 %v2021_v57 }
  0x90   :  { %1921 = vmatpush3.bf16.msra.mxu0 %v2022_v58 }
  0x91   :  { %1943 = vmatpush3.bf16.msra.mxu1 %v2023_v59  ;;  %1922 = vmatprep.subr.bf16.mxu0 %v2024_v60 }
  0x92   :  { %1944 = vmatprep.subr.bf16.mxu1 %v2025_v61 }
  0x94   :  { %1923 = vmatpush3.bf16.msra.mxu0 %v2026_v62 }
  0x95   :  { %1945 = vmatpush3.bf16.msra.mxu1 %v2027_v63  ;;  %1924 = vmatprep.subr.bf16.mxu0 %v2028_v0 }
  0x96   :  { %1946 = vmatprep.subr.bf16.mxu1 %v2029_v1 }
  0x98   :  { %1925 = vmatpush3.bf16.msra.mxu0 %v2030_v2 }
  0x99   :  { %1947 = vmatpush3.bf16.msra.mxu1 %v2031_v3  ;;  %1926 = vmatprep.subr.bf16.mxu0 %v2032_v4 }
  0x9a   :  { %1948 = vmatprep.subr.bf16.mxu1 %v2033_v5 }
  0x9c   :  { %1927 = vmatpush3.bf16.msra.mxu0 %v2034_v6 }
  0x9d   :  { %1949 = vmatpush3.bf16.msra.mxu1 %v2035_v7  ;;  %942 = vmatprep.subr.bf16.mxu0 %v2038_v17 }
  0x9e   :  { %1426 = vmatprep.subr.bf16.mxu1 %v1785_v37 }
  0x9f   :  { %782 = vmatmul.mubr.bf16.vlgmr.msra.gmra.mrb[4].mxu0 %v1700_v10 }
  0xa0   :  { %823 = vmatmul.mubr.bf16.vlgmr.msra.gmra.mrb[4].mxu1 %v1702_v14  ;;  %943 = vmatpush1.bf16.msra.mxu0 %v2036_v16  ;;  %v1009_v14 = vld [vmem:[#allocation10 + $0x48] sm:$0xff] }
  0xa1   :  { %944 = vmatprep.subr.bf16.mxu0 %v2041_v18  ;;  %974 = vmatprep.mubr.bf16.mxu0 %v2239_v32 }
  0xa2   :  { %1458 = vmatprep.mubr.bf16.mxu1 %v2239_v32  ;;  %1427 = vmatpush1.bf16.msra.mxu1 %v1784_v36 }
  0xa3   :  { %1428 = vmatprep.subr.bf16.mxu1 %v1793_v43  ;;  %v1816_v43 = vcombine.low %v1032_v38, %v1036_v39 }
  0xa4   :  { %945 = vmatpush1.bf16.msra.mxu0 %v2039_v19  ;;  %v1795_v19 = vcombine.high %v1009_v14, %v1013_v15 }
  0xa5   :  { %946 = vmatprep.subr.bf16.mxu0 %v2044_v20  ;;  %v1794_v20 = vcombine.low %v1009_v14, %v1013_v15  ;;  %v852_v14 = vlaneseq }
  0xa6   :  { %1429 = vmatpush1.bf16.msra.mxu1 %v1792_v44 }
  0xa7   :  { %v2379_v15 = vshrl.u32 %v852_v14, 7 }
  0xa8   :  { %947 = vmatpush1.bf16.msra.mxu0 %v2042_v21  ;;  %v1016_v21 = vld [vmem:[#allocation10 + $0x80] sm:$0xff] }
  0xa9   :  { %948 = vmatprep.subr.bf16.mxu0 %v2047_v22  ;;  %v1020_v22 = vld [vmem:[#allocation10 + $0xa0] sm:$0xff] }
  0xac   :  { %949 = vmatpush1.bf16.msra.mxu0 %v2045_v23  ;;  %v1017_v23 = vld [vmem:[#allocation10 + $0x88] sm:$0xff] }
  0xad   :  { %950 = vmatprep.subr.bf16.mxu0 %v2050_v24  ;;  %v1801_v24 = vcombine.high %v1016_v21, %v1020_v22 }
  0xaf   :  { %1430 = vmatprep.subr.bf16.mxu1 %v1801_v24 }
  0xb0   :  { %951 = vmatpush1.bf16.msra.mxu0 %v2048_v25  ;;  %v1021_v25 = vld [vmem:[#allocation10 + $0xa8] sm:$0xff] }
  0xb1   :  { %952 = vmatprep.subr.bf16.mxu0 %v2053_v26  ;;  %v1800_v26 = vcombine.low %v1016_v21, %v1020_v22 }
  0xb3   :  { %1431 = vmatpush1.bf16.msra.mxu1 %v1800_v26 }
  0xb4   :  { %953 = vmatpush1.bf16.msra.mxu0 %v2051_v27  ;;  %v1802_v27 = vcombine.low %v1017_v23, %v1021_v25 }
  0xb5   :  { %954 = vmatprep.subr.bf16.mxu0 %v2056_v28  ;;  %v1803_v28 = vcombine.high %v1017_v23, %v1021_v25 }
  0xb8   :  { %955 = vmatpush1.bf16.msra.mxu0 %v2054_v29  ;;  %v1024_v29 = vld [vmem:[#allocation10 + $0xc0] sm:$0xff] }
  0xb9   :  { %956 = vmatprep.subr.bf16.mxu0 %v2059_v30  ;;  %v1028_v30 = vld [vmem:[#allocation10 + $0xe0] sm:$0xff] }
  0xba   :  { %v1809_v33 = vcombine.high %v1024_v29, %v1028_v30  ;;  %v1808_v35 = vcombine.low %v1024_v29, %v1028_v30 }
  0xbc   :  { %957 = vmatpush1.bf16.msra.mxu0 %v2057_v31  ;;  %v1025_v31 = vld [vmem:[#allocation10 + $0xc8] sm:$0xff]  ;;  %1432 = vmatprep.subr.bf16.mxu1 %v1809_v33 }
  0xbd   :  { %1469 = vmatprep.subr.bf16.mxu0 %v1787_v42  ;;  %v1810_v36 = vcombine.low %v1025_v31, %v1029_v34  ;;  %v1811_v37 = vcombine.high %v1025_v31, %v1029_v34  ;;  %1433 = vmatpush1.bf16.msra.mxu1 %v1808_v35  ;;  %v1037_v42 = vld [vmem:[#allocation10 + $0x128] sm:$0xff]  ;;  %v1865_v34 = vld [vmem:[%s2454_s7] sm:$0xff]   ;;  %s2240_s7 = smov [#allocation12]  }
  0xbe   :  { %v1818_v44 = vcombine.low %v1033_v40, %v1037_v42  ;;  %v1866_v35 = vunpack.c.l.bf16 %v1865_v34  ;;  %s1677_s12 = sshll.u32 %s2240_s7, 4  ;;  %s1678_s12 = int_to_ptr.vmem [resolvable:$true] %s1677_s12 }
  0xbf   :  { %s2174_s1 = scalar_lea.vmem %s1678_s12, 768  ;;  %p2179_p13 = scmp.lt.s32.totalorder %s1678_s12, %s1678_s12 }
  0xc0   :  { %p2175_p12 = scmp.ne.s32.totalorder %s1678_s12, %s2174_s1  ;;  %p2180_p0 = scmp.lt.s32.totalorder %s2174_s1, %s2174_s1 }
  0xc2   :  { %p2181_p1 = por %p2180_p0, %p2179_p13 }
  0xc4   :  { %p2182_p2 = pnand %p2181_p1, %p2175_p12 }
 0x152   :  { %v1884_v45 = vpop.f32.mrb[0].mxu0 }
 0x153   :  { %v1906_v46 = vpop.f32.mrb[0].mxu1  ;;  %v1885_v48 = vpop.f32.mrb[1].mxu0 }
 0x154   :  { %v1886_v49 = vadd.f32 %v1885_v48, %v1884_v45  ;;  %v1907_v50 = vpop.f32.mrb[1].mxu1  ;;  %v1887_v51 = vpop.f32.mrb[2].mxu0  ;;  %v1819_v45 = vcombine.high %v1033_v40, %v1037_v42  ;;  %v1041_v48 = vld [vmem:[#allocation10 + $0x148] sm:$0xff]  ;;  %v1010_v42 = vld [vmem:[#allocation10 + $0x50] sm:$0xff] }
 0x155   :  { %v1908_v52 = vadd.f32 %v1907_v50, %v1906_v46  ;;  %v1909_v53 = vpop.f32.mrb[2].mxu1  ;;  %v1888_v54 = vpop.f32.mrb[3].mxu0  ;;  %v1040_v46 = vld [vmem:[#allocation10 + $0x140] sm:$0xff]  ;;  %v1045_v50 = vld [vmem:[#allocation10 + $0x168] sm:$0xff] }
 0x156   :  { %v702_v55 = vadd.f32 %v1886_v49, %v1695_v47  ;;  %v1889_v56 = vadd.f32 %v1888_v54, %v1887_v51  ;;  %v1910_v57 = vpop.f32.mrb[3].mxu1  ;;  %v1048_v51 = vld [vmem:[#allocation10 + $0x180] sm:$0xff]  ;;  %v1827_v54 = vcombine.high %v1041_v48, %v1045_v50 }
 0x157   :  { %v1911_v58 = vadd.f32 %v1910_v57, %v1909_v53  ;;  %v1826_v57 = vcombine.low %v1041_v48, %v1045_v50  ;;  %v1018_v50 = vld [vmem:[#allocation10 + $0x90] sm:$0xff] }
 0x158   :  { %v743_v59 = vadd.f32 %v1908_v52, %v702_v55  ;;  %v705_v60 = vadd.f32 %v1889_v56, %v1695_v47  ;;  %v1044_v47 = vld [vmem:[#allocation10 + $0x160] sm:$0xff]  ;;  %v1049_v55 = vld [vmem:[#allocation10 + $0x188] sm:$0xff] }
 0x159   :  { %v1825_v49 = vcombine.high %v1040_v46, %v1044_v47  ;;  %v1052_v52 = vld [vmem:[#allocation10 + $0x1a0] sm:$0xff]  ;;  %v1824_v53 = vcombine.low %v1040_v46, %v1044_v47  ;;  %v1053_v56 = vld [vmem:[#allocation10 + $0x1a8] sm:$0xff] }
 0x15a   :  { %v746_v61 = vadd.f32 %v1911_v58, %v705_v60  ;;  %v1833_v58 = vcombine.high %v1048_v51, %v1052_v52  ;;  %v1060_v60 = vld [vmem:[#allocation10 + $0x1e0] sm:$0xff] }
 0x172   :  { %v1928_v62 = vpop.f32.mrb[4].mxu0 }
 0x173   :  { %v1950_v63 = vpop.f32.mrb[4].mxu1  ;;  %v1929_v0 = vpop.f32.mrb[5].mxu0 }
 0x174   :  { %v1930_v1 = vadd.f32 %v1929_v0, %v1928_v62  ;;  %v1951_v2 = vpop.f32.mrb[5].mxu1  ;;  %v1931_v3 = vpop.f32.mrb[6].mxu0  ;;  %v2363_v62 = vld [vmem:[#allocation10 + $0x10] sm:$0xff]  ;;  %v2367_v0 = vld [vmem:[#allocation10 + $0x18] sm:$0xff] }
 0x175   :  { %v1952_v4 = vadd.f32 %v1951_v2, %v1950_v63  ;;  %v1953_v5 = vpop.f32.mrb[6].mxu1  ;;  %v1932_v6 = vpop.f32.mrb[7].mxu0  ;;  %v2365_v63 = vld [vmem:[#allocation10 + $0x30] sm:$0xff]  ;;  %v1061_v2 = vld [vmem:[#allocation10 + $0x1e8] sm:$0xff] }
 0x176   :  { %v784_v7 = vadd.f32 %v1930_v1, %v743_v59  ;;  %v1933_v8 = vadd.f32 %v1932_v6, %v1931_v3  ;;  %v1954_v9 = vpop.f32.mrb[7].mxu1  ;;  %v1056_v59 = vld [vmem:[#allocation10 + $0x1c0] sm:$0xff]  ;;  %v1057_v1 = vld [vmem:[#allocation10 + $0x1c8] sm:$0xff]  ;;  %v1788_v3 = vcombine.low %v2363_v62, %v2365_v63 }
 0x177   :  { %v1955_v10 = vadd.f32 %v1954_v9, %v1953_v5  ;;  %v1832_v5 = vcombine.low %v1048_v51, %v1052_v52  ;;  %v1843_v9 = vcombine.high %v1057_v1, %v1061_v2  ;;  %v1022_v51 = vld [vmem:[#allocation10 + $0xb0] sm:$0xff]  ;;  %v1019_v52 = vld [vmem:[#allocation10 + $0x98] sm:$0xff] }
 0x178   :  { %v825_v11 = vadd.f32 %v1952_v4, %v784_v7  ;;  %v787_v12 = vadd.f32 %v1933_v8, %v746_v61  ;;  %v1835_v61 = vcombine.high %v1049_v55, %v1053_v56  ;;  %v2371_v4 = vld [vmem:[#allocation10 + $0x38] sm:$0xff]  ;;  %v1834_v7 = vcombine.low %v1049_v55, %v1053_v56 }
 0x179   :  { %v1790_v6 = vcombine.low %v2367_v0, %v2371_v4  ;;  %v1841_v8 = vcombine.high %v1056_v59, %v1060_v60  ;;  %v1805_v56 = vcombine.high %v1018_v50, %v1022_v51 }
 0x17a   :  { %v828_v13 = vadd.f32 %v1955_v10, %v787_v12  ;;  %v831_v16 = vmax.f32 %v825_v11, 0.0  ;;  %v1840_v10 = vcombine.low %v1056_v59, %v1060_v60  ;;  %v1842_v11 = vcombine.low %v1057_v1, %v1061_v2  ;;  %v1030_v59 = vld [vmem:[#allocation10 + $0xf0] sm:$0xff]  ;;  %v1027_v60 = vld [vmem:[#allocation10 + $0xd8] sm:$0xff] }
 0x17b   :  { %v1789_v12 = vcombine.high %v2363_v62, %v2365_v63  ;;  %v1804_v62 = vcombine.low %v1018_v50, %v1022_v51  ;;  %v1034_v2 = vld [vmem:[#allocation10 + $0x110] sm:$0xff] }
 0x17c   :  { %v832_v17 = vmax.f32 %v828_v13, 0.0  ;;  %v1791_v13 = vcombine.high %v2367_v0, %v2371_v4  ;;  %v1035_v4 = vld [vmem:[#allocation10 + $0x118] sm:$0xff] }
 0x17e   :  { %v833_v18 = vpack.c.bf16 %v832_v17, %v831_v16  ;;  %v854_v16 = vsub.s32 0, %v2379_v15  ;;  %v850_v17 = vld [vmem:[%s2451_s4] sm:$0x3] }
 0x180   :  { %975 = vmatmul.mubr.bf16.vlgmr.msra.gmra.mrb[8].mxu0 %v833_v18  ;;  %v858_v18 = vsub.s32 1, %v2379_v15 }
 0x181   :  { %1470 = vmatpush1.bf16.msra.mxu0 %v1786_v41  ;;  %1501 = vmatprep.mubr.bf16.mxu0 %v2239_v32  ;;  %v1817_v41 = vcombine.high %v1032_v38, %v1036_v39 }
 0x182   :  { %1471 = vmatprep.subr.bf16.mxu0 %v1795_v19  ;;  %v855_v19 = vrot.slane %v850_v17, %v854_v16 }
 0x183   :  { %1434 = vmatprep.subr.bf16.mxu1 %v1817_v41 }
 0x184   :  { %1435 = vmatpush1.bf16.msra.mxu1 %v1816_v43  ;;  %v1014_v43 = vld [vmem:[#allocation10 + $0x70] sm:$0xff] }
 0x185   :  { %1472 = vmatpush1.bf16.msra.mxu0 %v1794_v20  ;;  %1436 = vmatprep.subr.bf16.mxu1 %v1825_v49  ;;  %v859_v20 = vrot.slane %v850_v17, %v858_v18  ;;  %v1797_v48 = vcombine.high %v1010_v42, %v1014_v43 }
 0x186   :  { %1473 = vmatprep.subr.bf16.mxu0 %v1803_v28 }
 0x188   :  { %1437 = vmatpush1.bf16.msra.mxu1 %v1824_v53  ;;  %v1023_v53 = vld [vmem:[#allocation10 + $0xb8] sm:$0xff] }
 0x189   :  { %1474 = vmatpush1.bf16.msra.mxu0 %v1802_v27  ;;  %1438 = vmatprep.subr.bf16.mxu1 %v1833_v58  ;;  %v1026_v58 = vld [vmem:[#allocation10 + $0xd0] sm:$0xff]  ;;  %v1806_v63 = vcombine.low %v1019_v52, %v1023_v53 }
 0x18a   :  { %1475 = vmatprep.subr.bf16.mxu0 %v1811_v37  ;;  %v1813_v0 = vcombine.high %v1026_v58, %v1030_v59 }
 0x18c   :  { %1439 = vmatpush1.bf16.msra.mxu1 %v1832_v5  ;;  %v1039_v5 = vld [vmem:[#allocation10 + $0x138] sm:$0xff] }
 0x18d   :  { %1476 = vmatpush1.bf16.msra.mxu0 %v1810_v36  ;;  %1440 = vmatprep.subr.bf16.mxu1 %v1841_v8  ;;  %v1867_v36 = vunpack.c.h.bf16 %v1865_v34  ;;  %v1822_v14 = vcombine.low %v1035_v4, %v1039_v5 }
 0x18e   :  { %1477 = vmatprep.subr.bf16.mxu0 %v1819_v45  ;;  %v1015_v45 = vld [vmem:[#allocation10 + $0x78] sm:$0xff] }
 0x190   :  { %1441 = vmatpush1.bf16.msra.mxu1 %v1840_v10  ;;  %v1046_v10 = vld [vmem:[#allocation10 + $0x170] sm:$0xff] }
 0x191   :  { %1478 = vmatpush1.bf16.msra.mxu0 %v1818_v44  ;;  %1512 = vmatprep.subr.bf16.mxu1 %v1789_v12  ;;  %v1011_v44 = vld [vmem:[#allocation10 + $0x58] sm:$0xff] }
 0x192   :  { %1479 = vmatprep.subr.bf16.mxu0 %v1827_v54  ;;  %v1799_v49 = vcombine.high %v1011_v44, %v1015_v45  ;;  %v1796_v54 = vcombine.low %v1010_v42, %v1014_v43  ;;  %v1798_v55 = vcombine.low %v1011_v44, %v1015_v45  ;;  %v1047_v12 = vld [vmem:[#allocation10 + $0x178] sm:$0xff] }
 0x195   :  { %1480 = vmatpush1.bf16.msra.mxu0 %v1826_v57  ;;  %v1807_v57 = vcombine.high %v1019_v52, %v1023_v53 }
 0x196   :  { %1481 = vmatprep.subr.bf16.mxu0 %v1835_v61  ;;  %v1031_v61 = vld [vmem:[#allocation10 + $0xf8] sm:$0xff] }
 0x197   :  { %v1815_v1 = vcombine.high %v1027_v60, %v1031_v61 }
 0x199   :  { %1482 = vmatpush1.bf16.msra.mxu0 %v1834_v7  ;;  %v1814_v7 = vcombine.low %v1027_v60, %v1031_v61 }
 0x19a   :  { %1483 = vmatprep.subr.bf16.mxu0 %v1843_v9  ;;  %v1042_v9 = vld [vmem:[#allocation10 + $0x150] sm:$0xff] }
 0x19b   :  { %v1829_v17 = vcombine.high %v1042_v9, %v1046_v10 }
 0x19d   :  { %1484 = vmatpush1.bf16.msra.mxu0 %v1842_v11  ;;  %v1043_v11 = vld [vmem:[#allocation10 + $0x158] sm:$0xff] }
 0x19e   :  { %1555 = vmatprep.subr.bf16.mxu0 %v1791_v13 }
 0x253   :  { %v976_v21 = vpop.f32.mrb[8].mxu0 }
 0x254   :  { %v977_v22 = vadd.f32 %v976_v21, %v855_v19  ;;  %v978_v23 = vpop.f32.mrb[9].mxu0  ;;  %v1054_v21 = vld [vmem:[#allocation10 + $0x1b0] sm:$0xff] }
 0x255   :  { %v979_v24 = vadd.f32 %v978_v23, %v859_v20  ;;  %v980_v25 = vpop.f32.mrb[10].mxu0  ;;  %v1055_v23 = vld [vmem:[#allocation10 + $0x1b8] sm:$0xff] }
 0x256   :  { %1654 = vst [vmem:[#allocation12] sm:$0xff] %v977_v22  ;;  %v981_v26 = vadd.f32 %v980_v25, %v855_v19  ;;  %v982_v27 = vpop.f32.mrb[11].mxu0  ;;  %v1831_v19 = vcombine.high %v1043_v11, %v1047_v12  ;;  %v1830_v25 = vcombine.low %v1043_v11, %v1047_v12 }
 0x257   :  { %v989_v28 = vmul.f32 0.5, %v979_v24  ;;  %1655 = vst [vmem:[#allocation12 + $0x8] sm:$0xff] %v979_v24  ;;  %v983_v29 = vadd.f32 %v982_v27, %v859_v20  ;;  %v1050_v20 = vld [vmem:[#allocation10 + $0x190] sm:$0xff]  ;;  %v1828_v24 = vcombine.low %v1042_v9, %v1046_v10 }
 0x258   :  { %1657 = vst [vmem:[#allocation12 + $0x18] sm:$0xff] %v981_v26 }
 0x259   :  { %v991_v30 = vmul.f32 1.442695, %v989_v28  ;;  %v990_v31 = vmul.f32 0.5, %v983_v29  ;;  %1658 = vst [vmem:[#allocation12 + $0x20] sm:$0xff] %v983_v29  ;;  %v1058_v28 = vld [vmem:[#allocation10 + $0x1d0] sm:$0xff] }
 0x25a   :  { %v1062_v29 = vld [vmem:[#allocation10 + $0x1f0] sm:$0xff] }
 0x25b   :  { %2060 = vpow2.f32 %v991_v30  ;;  %v993_v33 = vmul.f32 1.442695, %v990_v31  ;;  %v1059_v30 = vld [vmem:[#allocation10 + $0x1d8] sm:$0xff] }
 0x25c   :  { %v1063_v31 = vld [vmem:[#allocation10 + $0x1f8] sm:$0xff] }
 0x25d   :  { %2062 = vpow2.f32 %v993_v33  ;;  %v1836_v33 = vcombine.low %v1050_v20, %v1054_v21 }
 0x265   :  { %v2061_v37 = vpop.eup %2060 }
 0x266   :  { %v995_v38 = vmul.f32 %v2061_v37, %v1866_v35  ;;  %v1845_v35 = vcombine.high %v1058_v28, %v1062_v29  ;;  %v1844_v37 = vcombine.low %v1058_v28, %v1062_v29 }
 0x267   :  { %v2063_v39 = vpop.eup %2062 }
 0x268   :  { %v996_v40 = vmul.f32 %v2063_v39, %v1867_v36  ;;  %v997_v41 = vadd.f32 %v995_v38, %v977_v22  ;;  %v1051_v22 = vld [vmem:[#allocation10 + $0x198] sm:$0xff]  ;;  %v1847_v36 = vcombine.high %v1059_v30, %v1063_v31  ;;  %v1846_v38 = vcombine.low %v1059_v30, %v1063_v31 }
 0x269   :  { %v1839_v27 = vcombine.high %v1051_v22, %v1055_v23  ;;  %v1838_v34 = vcombine.low %v1051_v22, %v1055_v23 }
 0x26a   :  { %v998_v46 = vadd.f32 %v996_v40, %v981_v26  ;;  %1656 = vst [vmem:[#allocation12 + $0x10] sm:$0xff] %v997_v41  ;;  %v1837_v26 = vcombine.high %v1050_v20, %v1054_v21 }
 0x26c   :  { %v2393_v47 = vpack.c.bf16 %v998_v46, %v997_v41  ;;  %1659 = vst [vmem:[#allocation12 + $0x28] sm:$0xff] %v998_v46 }
 0x26e   :  { %1459 = vmatmul.mubr.bf16.vlgmr.msra.gmra.mrb[8].mxu1 %v2393_v47  ;;  %1502 = vmatmul.mubr.bf16.vlgmr.msra.gmra.mrb[12].mxu0 %v2393_v47 }
 0x26f   :  { %1513 = vmatpush1.bf16.msra.mxu1 %v1788_v3  ;;  %1556 = vmatpush1.bf16.msra.mxu0 %v1790_v6  ;;  %v1038_v3 = vld [vmem:[#allocation10 + $0x130] sm:$0xff]  ;;  %v1812_v6 = vcombine.low %v1026_v58, %v1030_v59 }
 0x270   :  { %1514 = vmatprep.subr.bf16.mxu1 %v1797_v48  ;;  %1557 = vmatprep.subr.bf16.mxu0 %v1799_v49  ;;  %v1821_v8 = vcombine.high %v1034_v2, %v1038_v3  ;;  %v1820_v13 = vcombine.low %v1034_v2, %v1038_v3 }
 0x271   :  { %1544 = vmatprep.mubr.bf16.mxu1 %v2239_v32  ;;  %1587 = vmatprep.mubr.bf16.mxu0 %v2239_v32  ;;  %v1823_v32 = vcombine.high %v1035_v4, %v1039_v5 }
 0x273   :  { %1515 = vmatpush1.bf16.msra.mxu1 %v1796_v54  ;;  %1558 = vmatpush1.bf16.msra.mxu0 %v1798_v55 }
 0x274   :  { %1516 = vmatprep.subr.bf16.mxu1 %v1805_v56  ;;  %1559 = vmatprep.subr.bf16.mxu0 %v1807_v57 }
 0x277   :  { %1517 = vmatpush1.bf16.msra.mxu1 %v1804_v62  ;;  %1560 = vmatpush1.bf16.msra.mxu0 %v1806_v63 }
 0x278   :  { %1518 = vmatprep.subr.bf16.mxu1 %v1813_v0  ;;  %1561 = vmatprep.subr.bf16.mxu0 %v1815_v1 }
 0x27b   :  { %1519 = vmatpush1.bf16.msra.mxu1 %v1812_v6  ;;  %1562 = vmatpush1.bf16.msra.mxu0 %v1814_v7 }
 0x27c   :  { %1520 = vmatprep.subr.bf16.mxu1 %v1821_v8  ;;  %1563 = vmatprep.subr.bf16.mxu0 %v1823_v32 }
 0x27f   :  { %1521 = vmatpush1.bf16.msra.mxu1 %v1820_v13  ;;  %1564 = vmatpush1.bf16.msra.mxu0 %v1822_v14 }
 0x280   :  { %1522 = vmatprep.subr.bf16.mxu1 %v1829_v17  ;;  %1565 = vmatprep.subr.bf16.mxu0 %v1831_v19 }
 0x283   :  { %1523 = vmatpush1.bf16.msra.mxu1 %v1828_v24  ;;  %1566 = vmatpush1.bf16.msra.mxu0 %v1830_v25 }
 0x284   :  { %1524 = vmatprep.subr.bf16.mxu1 %v1837_v26  ;;  %1567 = vmatprep.subr.bf16.mxu0 %v1839_v27 }
 0x287   :  { %1525 = vmatpush1.bf16.msra.mxu1 %v1836_v33  ;;  %1568 = vmatpush1.bf16.msra.mxu0 %v1838_v34 }
 0x288   :  { %1526 = vmatprep.subr.bf16.mxu1 %v1845_v35  ;;  %1569 = vmatprep.subr.bf16.mxu0 %v1847_v36 }
 0x28b   :  { %1527 = vmatpush1.bf16.msra.mxu1 %v1844_v37  ;;  %1570 = vmatpush1.bf16.msra.mxu0 %v1846_v38 }
 0x28e   :  { %1545 = vmatmul.mubr.bf16.vlgmr.msra.gmra.mrb[12].mxu1 %v2393_v47  ;;  %1588 = vmatmul.mubr.bf16.vlgmr.msra.gmra.mrb[16].mxu0 %v2393_v47 }
 0x28f   :  { %2185 = shalt.err (!%p2182_p2)
}
 0x290   :  { %s2186_s14 = scalar_lea.hbm %s2456_s9, 768 }
 0x291   :  { %p2187_p3 = scmp.ne.s32.totalorder %s2456_s9, %s2186_s14  ;;  %p2190_p4 = scmp.lt.u32.totalorder %s2186_s14, %s2456_s9 }
 0x293   :  { %p2192_p5 = pnand %p2190_p4, %p2187_p3 }
 0x295   :  { %2195 = shalt.err (!%p2192_p5)
}
 0x296   :  { %s2241_s18 = smov 384   ;;  %s2242_s19 = smov 24   ;;  %v1076_v39 = vsub.s32 2, %v2379_v15  ;;  %v1064_v40 = vld [vmem:[%s2453_s6] sm:$0xff]  ;;  %v1080_v41 = vsub.s32 3, %v2379_v15  ;;  %v1084_v0 = vsub.s32 4, %v2379_v15 }
 0x297   :  { %1683 = dma.vmem_to_hbm [thread:$0]  %s1678_s12, 768, %s2456_s9, [#allocation13], %s2241_s18, %s2241_s18, %s2242_s19   ;;  %v1069_v42 = vrot.slane %v1064_v40, %v854_v16  ;;  %v1073_v44 = vrot.slane %v1064_v40, %v858_v18  ;;  %v1092_v1 = vsub.s32 6, %v2379_v15  ;;  %v1088_v2 = vsub.s32 5, %v2379_v15 }
 0x298   :  { %v1077_v43 = vrot.slane %v1064_v40, %v1076_v39  ;;  %v1081_v45 = vrot.slane %v1064_v40, %v1080_v41  ;;  %v1096_v3 = vsub.s32 7, %v2379_v15  ;;  %v1085_v4 = vrot.slane %v1064_v40, %v1084_v0  ;;  %s2243_s6 = smov [#allocation11]  }
 0x299   :  { %v1093_v5 = vrot.slane %v1064_v40, %v1092_v1  ;;  %v1089_v6 = vrot.slane %v1064_v40, %v1088_v2  ;;  %s1665_s9 = sshll.u32 %s2243_s6, 4  ;;  %s1666_s9 = int_to_ptr.vmem [resolvable:$true] %s1665_s9 }
 0x29a   :  { %v1097_v7 = vrot.slane %v1064_v40, %v1096_v3  ;;  %s2196_s25 = scalar_lea.vmem %s1666_s9, 1024  ;;  %p2201_p7 = scmp.lt.s32.totalorder %s1666_s9, %s1666_s9 }
 0x29b   :  { %p2197_p6 = scmp.ne.s32.totalorder %s1666_s9, %s2196_s25  ;;  %p2202_p8 = scmp.lt.s32.totalorder %s2196_s25, %s2196_s25 }
 0x29d   :  { %p2203_p9 = por %p2202_p8, %p2201_p7 }
 0x29f   :  { %p2204_p10 = pnand %p2203_p9, %p2197_p6 }
 0x341   :  { %v1460_v46 = vpop.f32.mrb[8].mxu1  ;;  %v1503_v47 = vpop.f32.mrb[12].mxu0 }
 0x342   :  { %v1461_v48 = vadd.f32 %v1460_v46, %v1069_v42  ;;  %v1504_v49 = vadd.f32 %v1503_v47, %v1077_v43  ;;  %v1462_v50 = vpop.f32.mrb[9].mxu1  ;;  %v1505_v51 = vpop.f32.mrb[13].mxu0 }
 0x343   :  { %v1463_v52 = vadd.f32 %v1462_v50, %v1073_v44  ;;  %v1506_v53 = vadd.f32 %v1505_v51, %v1081_v45  ;;  %v1464_v54 = vpop.f32.mrb[10].mxu1  ;;  %v1507_v55 = vpop.f32.mrb[14].mxu0 }
 0x344   :  { %v1465_v56 = vadd.f32 %v1464_v54, %v1069_v42  ;;  %v1508_v57 = vadd.f32 %v1507_v55, %v1077_v43  ;;  %v1466_v58 = vpop.f32.mrb[11].mxu1  ;;  %v1509_v59 = vpop.f32.mrb[15].mxu0 }
 0x345   :  { %v1856_v16 = vpack.c.bf16 %v1463_v52, %v1461_v48  ;;  %v1857_v60 = vpack.c.bf16 %v1506_v53, %v1504_v49  ;;  %v1467_v61 = vadd.f32 %v1466_v58, %v1073_v44  ;;  %v1510_v62 = vadd.f32 %v1509_v59, %v1081_v45 }
 0x347   :  { %1646 = vst [vmem:[#allocation11] sm:$0xff] %v1856_v16  ;;  %1647 = vst [vmem:[#allocation11 + $0x8] sm:$0xff] %v1857_v60  ;;  %v1860_v18 = vpack.c.bf16 %v1467_v61, %v1465_v56  ;;  %v1861_v63 = vpack.c.bf16 %v1510_v62, %v1508_v57 }
 0x349   :  { %1650 = vst [vmem:[#allocation11 + $0x20] sm:$0xff] %v1860_v18  ;;  %1651 = vst [vmem:[#allocation11 + $0x28] sm:$0xff] %v1861_v63 }
 0x361   :  { %v1546_v8 = vpop.f32.mrb[12].mxu1  ;;  %v1589_v32 = vpop.f32.mrb[16].mxu0 }
 0x362   :  { %v1547_v9 = vadd.f32 %v1546_v8, %v1085_v4  ;;  %v1590_v10 = vadd.f32 %v1589_v32, %v1093_v5  ;;  %v1548_v11 = vpop.f32.mrb[13].mxu1  ;;  %v1591_v12 = vpop.f32.mrb[17].mxu0 }
 0x363   :  { %v1549_v13 = vadd.f32 %v1548_v11, %v1089_v6  ;;  %v1592_v14 = vadd.f32 %v1591_v12, %v1097_v7  ;;  %v1550_v17 = vpop.f32.mrb[14].mxu1  ;;  %v1593_v19 = vpop.f32.mrb[18].mxu0 }
 0x364   :  { %v1551_v20 = vadd.f32 %v1550_v17, %v1085_v4  ;;  %v1594_v21 = vadd.f32 %v1593_v19, %v1093_v5  ;;  %v1552_v22 = vpop.f32.mrb[15].mxu1  ;;  %v1595_v23 = vpop.f32.mrb[19].mxu0 }
 0x365   :  { %v1858_v15 = vpack.c.bf16 %v1549_v13, %v1547_v9  ;;  %v1859_v24 = vpack.c.bf16 %v1592_v14, %v1590_v10  ;;  %v1553_v25 = vadd.f32 %v1552_v22, %v1089_v6  ;;  %v1596_v26 = vadd.f32 %v1595_v23, %v1097_v7 }
 0x367   :  { %1648 = vst [vmem:[#allocation11 + $0x10] sm:$0xff] %v1858_v15  ;;  %1649 = vst [vmem:[#allocation11 + $0x18] sm:$0xff] %v1859_v24  ;;  %v1862_v27 = vpack.c.bf16 %v1553_v25, %v1551_v20  ;;  %v1863_v28 = vpack.c.bf16 %v1596_v26, %v1594_v21 }
 0x369   :  { %1652 = vst [vmem:[#allocation11 + $0x30] sm:$0xff] %v1862_v27  ;;  %1653 = vst [vmem:[#allocation11 + $0x38] sm:$0xff] %v1863_v28 }
 0x36a   :  { %2207 = shalt.err (!%p2204_p10)
}
 0x36b   :  { %s2208_s28 = scalar_lea.hbm %s2455_s8, 1024 }
 0x36c   :  { %p2209_p11 = scmp.ne.s32.totalorder %s2455_s8, %s2208_s28  ;;  %p2212_p12 = scmp.lt.u32.totalorder %s2208_s28, %s2455_s8 }
 0x36e   :  { %p2214_p13 = pnand %p2212_p12, %p2209_p11 }
 0x370   :  { %2217 = shalt.err (!%p2214_p13)
}
 0x371   :  { %1671 = dma.vmem_to_hbm [thread:$0]  %s1666_s9, 1024, %s2455_s8, [#allocation4], %s2235_s3, %s2235_s3, %s2236_s24  }
 0x372   :  { %2224 = dma.done.wait [#allocation4], 1024  }
 0x373   :  { %2225 = vsyncadd [#allocation4], 4294966272 }
 0x374   :  { %2226 = dma.done.wait [#allocation13], 768  }
 0x375   :  { %2227 = vsyncadd [#allocation13], 4294966528 }
 0x376   :  { %1690 = vsyncpa [#allocation3], 1 }
 0x377   :  { %1691 = vsyncpa [#allocation6], 1 }
 0x378   :  { %1692 = vsyncpa [#allocation9], 1 }
 0x379   :  { %1693 = vsyncpa [#allocation4], 1 }
 0x37a   :  { %1694 = vsyncpa [#allocation13], 1 }

</bundles_post_ra>
